<compile_context>
chip_gen: v7x
topology: tpu7x:2x2x1
jax: 0.10.0
libtpu: 0.0.40
codegen_flags: <defaults>
</compile_context>

<pallas_src>
import jax
import jax.numpy as jnp
from jax.experimental import pallas as pl
from jax.experimental.pallas import tpu as pltpu


# ----------------------------------------------------------------- helpers --

def _round_up(x, m):
    return (x + m - 1) // m * m


def _pick_tn(vp, hp):
    """Largest lane-dense vocab tile whose double-buffered bf16 weight block
    stays well under the scoped-VMEM budget (v7x: 64 MiB physical)."""
    budget = 8 * 1024 * 1024
    for tn in (2048, 1024, 512, 256, 128):
        if vp % tn == 0 and 2 * hp * tn * 2 <= budget:
            return tn
    return 128


# ----------------------------------------------------------------- kernels --

def _lstm_stack_kernel(x0_ref, h_ref, c_ref, w_ih_ref, w_hh_ref, b_ref,
                       h_out_ref, c_out_ref, x_scr):
    """Grid = (num_layers,).  One grid step = one LSTM layer, one time step.

    x0:   [Bp, Dp]      bf16 embedded input (only consumed at layer 0)
    h, c: [Bp, Hp]      f32 previous hidden / cell state of this layer
    w_ih: [Dp, 4*Hp]    bf16 (gate blocks i,f,g,o each Hp lanes wide)
    w_hh: [Hp, 4*Hp]    bf16
    b:    [1, 4*Hp]     f32 (b_ih + b_hh)
    x_scr [Bp, Dp]      bf16 VMEM carry of the layer input across grid steps
    """
    l = pl.program_id(0)

    @pl.when(l == 0)
    def _():
        x_scr[...] = x0_ref[...]

    x = x_scr[...]                                   # bf16 [Bp, Dp]
    h = h_ref[...].astype(jnp.bfloat16)              # bf16 [Bp, Hp]
    c = c_ref[...]                                   # f32  [Bp, Hp]

    gates = (jnp.dot(x, w_ih_ref[...], preferred_element_type=jnp.float32)
             + jnp.dot(h, w_hh_ref[...], preferred_element_type=jnp.float32)
             + b_ref[...])                           # f32 [Bp, 4*Hp]

    Hp = h_ref.shape[-1]
    # Lane-aligned gate slices (Hp is a multiple of 128); nonlinearities in f32.
    i_g = jax.nn.sigmoid(gates[:, 0 * Hp:1 * Hp])
    f_g = jax.nn.sigmoid(gates[:, 1 * Hp:2 * Hp])
    g_g = jnp.tanh(gates[:, 2 * Hp:3 * Hp])
    o_g = jax.nn.sigmoid(gates[:, 3 * Hp:4 * Hp])

    c_new = f_g * c + i_g * g_g
    h_new = o_g * jnp.tanh(c_new)

    h_out_ref[...] = h_new
    c_out_ref[...] = c_new
    # Feed next layer (padded lanes of h_new are exactly zero by construction).
    x_scr[:, :Hp] = h_new.astype(jnp.bfloat16)


def _fc_out_kernel(x_ref, w_ref, b_ref, out_ref):
    """One vocab tile of fc_out: [Bp, Hp] x [Hp, TN] + [1, TN] -> [Bp, TN]."""
    out_ref[...] = (jnp.dot(x_ref[...], w_ref[...],
                            preferred_element_type=jnp.float32)
                    + b_ref[...])


# ------------------------------------------------------------- pallas glue --

def _lstm_stack(x0, h, c, w_ih, w_hh, b):
    L, Bp, Hp = h.shape
    Dp = x0.shape[1]
    cost = pl.CostEstimate(
        flops=int(2 * L * Bp * (Dp + Hp) * 4 * Hp),
        transcendentals=int(5 * L * Bp * Hp),
        bytes_accessed=int(2 * (w_ih.size + w_hh.size + x0.size)
                           + 4 * (b.size + 2 * h.size + 2 * c.size)))
    return pl.pallas_call(
        _lstm_stack_kernel,
        out_shape=(jax.ShapeDtypeStruct((L, Bp, Hp), jnp.float32),
                   jax.ShapeDtypeStruct((L, Bp, Hp), jnp.float32)),
        grid_spec=pltpu.PrefetchScalarGridSpec(
            num_scalar_prefetch=0,
            grid=(L,),
            in_specs=[
                pl.BlockSpec((Bp, Dp), lambda l: (0, 0)),                 # x0
                pl.BlockSpec((None, Bp, Hp), lambda l: (l, 0, 0)),        # h
                pl.BlockSpec((None, Bp, Hp), lambda l: (l, 0, 0)),        # c
                pl.BlockSpec((None, Dp, 4 * Hp), lambda l: (l, 0, 0)),    # w_ih
                pl.BlockSpec((None, Hp, 4 * Hp), lambda l: (l, 0, 0)),    # w_hh
                pl.BlockSpec((None, 1, 4 * Hp), lambda l: (l, 0, 0)),     # bias
            ],
            out_specs=(
                pl.BlockSpec((None, Bp, Hp), lambda l: (l, 0, 0)),
                pl.BlockSpec((None, Bp, Hp), lambda l: (l, 0, 0)),
            ),
            scratch_shapes=[pltpu.VMEM((Bp, Dp), jnp.bfloat16)],
        ),
        compiler_params=pltpu.CompilerParams(
            dimension_semantics=("arbitrary",)),      # layers are sequential
        cost_estimate=cost,
    )(x0, h, c, w_ih, w_hh, b)


def _fc_out(x, w, b, tn):
    Bp, Hp = x.shape
    Vp = w.shape[1]
    cost = pl.CostEstimate(
        flops=int(2 * Bp * Hp * Vp),
        transcendentals=0,
        bytes_accessed=int(2 * (x.size + w.size) + 4 * (b.size + Bp * Vp)))
    return pl.pallas_call(
        _fc_out_kernel,
        out_shape=jax.ShapeDtypeStruct((Bp, Vp), jnp.float32),
        grid_spec=pltpu.PrefetchScalarGridSpec(
            num_scalar_prefetch=0,
            grid=(Vp // tn,),
            in_specs=[
                pl.BlockSpec((Bp, Hp), lambda j: (0, 0)),
                pl.BlockSpec((Hp, tn), lambda j: (0, j)),
                pl.BlockSpec((1, tn), lambda j: (0, j)),
            ],
            out_specs=pl.BlockSpec((Bp, tn), lambda j: (0, j)),
        ),
        compiler_params=pltpu.CompilerParams(
            dimension_semantics=("parallel",)),       # v7x: shard vocab tiles
        cost_estimate=cost,
    )(x, w, b)


# ------------------------------------------------------------------ params --

def init_decoder_params(key, target_vocab_size, embedding_size, hidden_size,
                        decoder_layers, pad_idx=0):
    V, E, H, L = target_vocab_size, embedding_size, hidden_size, decoder_layers
    Hp = _round_up(H, 128)
    Ep = _round_up(E, 128)
    Dp = max(Ep, Hp)
    Vp = _round_up(V, 128)
    TN = _pick_tn(Vp, Hp)

    keys = jax.random.split(key, 3 + 4 * L)
    k = 1.0 / jnp.sqrt(H)

    # nn.Embedding: N(0, 1), padding_idx row zeroed.
    emb = jax.random.normal(keys[0], (V, E), jnp.float32)
    emb = emb.at[pad_idx].set(0.0)

    w_ih_pad, w_hh_pad, b_pad, layers_ref = [], [], [], []
    for l in range(L):
        in_dim = E if l == 0 else H
        kk = keys[3 + 4 * l: 7 + 4 * l]
        w_ih = jax.random.uniform(kk[0], (4 * H, in_dim), jnp.float32, -k, k)
        w_hh = jax.random.uniform(kk[1], (4 * H, H), jnp.float32, -k, k)
        b_ih = jax.random.uniform(kk[2], (4 * H,), jnp.float32, -k, k)
        b_hh = jax.random.uniform(kk[3], (4 * H,), jnp.float32, -k, k)

        w_ih_t = w_ih.T.astype(jnp.bfloat16)              # [in, 4H]
        w_hh_t = w_hh.T.astype(jnp.bfloat16)              # [H, 4H]
        bias = (b_ih + b_hh)[None, :]                     # [1, 4H] f32
        layers_ref.append(dict(w_ih_t=w_ih_t, w_hh_t=w_hh_t, b=bias))

        # Pad per-gate to lane-aligned blocks of width Hp (gate order i,f,g,o).
        wi = jnp.zeros((Dp, 4, Hp), jnp.bfloat16)
        wi = wi.at[:in_dim, :, :H].set(w_ih_t.reshape(in_dim, 4, H))
        w_ih_pad.append(wi.reshape(Dp, 4 * Hp))

        wh = jnp.zeros((Hp, 4, Hp), jnp.bfloat16)
        wh = wh.at[:H, :, :H].set(w_hh_t.reshape(H, 4, H))
        w_hh_pad.append(wh.reshape(Hp, 4 * Hp))

        bp = jnp.zeros((1, 4, Hp), jnp.float32)
        bp = bp.at[:, :, :H].set(bias.reshape(1, 4, H))
        b_pad.append(bp.reshape(1, 4 * Hp))

    kf = 1.0 / jnp.sqrt(H)
    fc_w = jax.random.uniform(keys[1], (V, H), jnp.float32, -kf, kf)
    fc_b = jax.random.uniform(keys[2], (V,), jnp.float32, -kf, kf)

    fc_w_pad = jnp.zeros((Hp, Vp), jnp.bfloat16).at[:H, :V].set(
        fc_w.T.astype(jnp.bfloat16))
    fc_b_pad = jnp.zeros((1, Vp), jnp.float32).at[:, :V].set(fc_b[None, :])

    return dict(
        embedding=emb,
        w_ih=jnp.stack(w_ih_pad),          # [L, Dp, 4*Hp] bf16
        w_hh=jnp.stack(w_hh_pad),          # [L, Hp, 4*Hp] bf16
        b=jnp.stack(b_pad),                # [L, 1, 4*Hp]  f32
        fc_w=fc_w_pad, fc_b=fc_b_pad,      # [Hp, Vp] bf16 / [1, Vp] f32
        layers_ref=layers_ref,
        fc_w_t_ref=fc_w.T.astype(jnp.bfloat16), fc_b_ref=fc_b[None, :],
        dims=dict(V=V, E=E, H=H, L=L, Hp=Hp, Dp=Dp, Vp=Vp, TN=TN),
    )


# ----------------------------------------------------------------- decoder --

def decoder_forward(params, input_token, hidden):
    """input_token: int32 [B]; hidden: (h, c) each [L, B, H] f32.
    Returns (logits [B, V] f32, (h_new, c_new))."""
    d = params['dims']
    V, E, H, L = d['V'], d['E'], d['H'], d['L']
    Hp, Dp, TN = d['Hp'], d['Dp'], d['TN']
    h_prev, c_prev = hidden
    B = input_token.shape[0]
    Bp = _round_up(max(B, 8), 8)

    # Embedding lookup + dropout(eval) = identity (plain-JAX glue).
    x = params['embedding'][input_token]                         # [B, E] f32
    x0 = jnp.zeros((Bp, Dp), jnp.bfloat16).at[:B, :E].set(x.astype(jnp.bfloat16))
    hp = jnp.zeros((L, Bp, Hp), jnp.float32).at[:, :B, :H].set(h_prev)
    cp = jnp.zeros((L, Bp, Hp), jnp.float32).at[:, :B, :H].set(c_prev)

    h_new, c_new = _lstm_stack(x0, hp, cp,
                               params['w_ih'], params['w_hh'], params['b'])
    logits_p = _fc_out(h_new[L - 1].astype(jnp.bfloat16),
                       params['fc_w'], params['fc_b'], TN)

    return logits_p[:B, :V], (h_new[:, :B, :H], c_new[:, :B, :H])


# -------------------------------------------------------- pure-JAX reference --

def decoder_forward_ref(params, input_token, hidden):
    H = params['dims']['H']
    h_prev, c_prev = hidden
    x = params['embedding'][input_token].astype(jnp.bfloat16)
    h_list, c_list = [], []
    for l, layer in enumerate(params['layers_ref']):
        gates = (jnp.dot(x, layer['w_ih_t'], preferred_element_type=jnp.float32)
                 + jnp.dot(h_prev[l].astype(jnp.bfloat16), layer['w_hh_t'],
                           preferred_element_type=jnp.float32)
                 + layer['b'])
        i_g = jax.nn.sigmoid(gates[:, 0 * H:1 * H])
        f_g = jax.nn.sigmoid(gates[:, 1 * H:2 * H])
        g_g = jnp.tanh(gates[:, 2 * H:3 * H])
        o_g = jax.nn.sigmoid(gates[:, 3 * H:4 * H])
        c_new = f_g * c_prev[l] + i_g * g_g
        h_new = o_g * jnp.tanh(c_new)
        h_list.append(h_new)
        c_list.append(c_new)
        x = h_new.astype(jnp.bfloat16)
    logits = (jnp.dot(x, params['fc_w_t_ref'], preferred_element_type=jnp.float32)
              + params['fc_b_ref'])
    return logits, (jnp.stack(h_list), jnp.stack(c_list))


# --------------------------------------------------------------------- main --

if __name__ == "__main__":
    V, E, H, L, B = 64, 32, 32, 2, 4

    key = jax.random.PRNGKey(0)
    kp, kt, kh, kc = jax.random.split(key, 4)

    params = init_decoder_params(kp, V, E, H, L, pad_idx=0)
    input_token = jax.random.randint(kt, (B,), 0, V, dtype=jnp.int32)
    h0 = jax.random.normal(kh, (L, B, H), jnp.float32)
    c0 = jax.random.normal(kc, (L, B, H), jnp.float32)

    fwd = jax.jit(lambda tok, h, c: decoder_forward(params, tok, (h, c)))
    logits, (h1, c1) = fwd(input_token, h0, c0)
    jax.block_until_ready((logits, h1, c1))

    ref_logits, (ref_h, ref_c) = decoder_forward_ref(params, input_token,
                                                     (h0, c0))
    assert logits.shape == (B, V)
    assert h1.shape == (L, B, H) and c1.shape == (L, B, H)
    # bf16 matmul operands on both paths; tolerance covers accumulation-order /
    # transcendental-lowering differences only.
    assert jnp.allclose(logits, ref_logits, atol=1e-2, rtol=1e-2)
    assert jnp.allclose(h1, ref_h, atol=1e-2, rtol=1e-2)
    assert jnp.allclose(c1, ref_c, atol=1e-2, rtol=1e-2)

    print("KERNEL_OK")
</pallas_src>

<mosaic_0001>
module attributes {stable_mosaic.version = 11 : i64} {
  func.func @_lstm_stack_kernel(%arg0: i32, %arg1: memref<8x128xbf16, #tpu.memory_space<vmem>>, %arg2: memref<1x8x128xf32, #tpu.memory_space<vmem>>, %arg3: memref<1x8x128xf32, #tpu.memory_space<vmem>>, %arg4: memref<1x128x512xbf16, #tpu.memory_space<vmem>>, %arg5: memref<1x128x512xbf16, #tpu.memory_space<vmem>>, %arg6: memref<1x1x512xf32, #tpu.memory_space<vmem>>, %arg7: memref<1x8x128xf32, #tpu.memory_space<vmem>>, %arg8: memref<1x8x128xf32, #tpu.memory_space<vmem>>, %arg9: memref<8x128xbf16, #tpu.memory_space<vmem>>) attributes {dimension_semantics = [#tpu.dimension_semantics<arbitrary>], iteration_bounds = array<i64: 2>, scalar_prefetch = 0 : i64, scratch_operands = 1 : i64, tpu.core_type = #tpu.core_type<tc>, window_params = [{pipeline_mode = #tpu.pipeline_mode<synchronous>, transform_indices = @transform_0, window_bounds = array<i64: 8, 128>}, {transform_indices = @transform_1, window_bounds = array<i64: 1, 8, 128>}, {transform_indices = @transform_2, window_bounds = array<i64: 1, 8, 128>}, {transform_indices = @transform_3, window_bounds = array<i64: 1, 128, 512>}, {transform_indices = @transform_4, window_bounds = array<i64: 1, 128, 512>}, {transform_indices = @transform_5, window_bounds = array<i64: 1, 1, 512>}, {transform_indices = @transform_6, window_bounds = array<i64: 1, 8, 128>}, {transform_indices = @transform_7, window_bounds = array<i64: 1, 8, 128>}]} {
    %c0_i32 = arith.constant 0 : i32
    %0 = arith.cmpi eq, %arg0, %c0_i32 : i32
    %1 = arith.extui %0 : i1 to i32
    %c0_i32_0 = arith.constant 0 : i32
    %2 = arith.cmpi ne, %1, %c0_i32_0 : i32
    scf.if %2 {
      %c0_29 = arith.constant 0 : index
      %c0_30 = arith.constant 0 : index
      %53 = vector.load %arg1[%c0_29, %c0_30] : memref<8x128xbf16, #tpu.memory_space<vmem>>, vector<8x128xbf16>
      %c0_31 = arith.constant 0 : index
      %c0_32 = arith.constant 0 : index
      %54 = vector.load %arg9[%c0_31, %c0_32] : memref<8x128xbf16, #tpu.memory_space<vmem>>, vector<8x128xbf16>
      tpu.vector_store %arg9[%c0_31, %c0_32], %53 {strides = array<i32>} : memref<8x128xbf16, #tpu.memory_space<vmem>>, vector<8x128xbf16>,
    } else {
    }
    %c0 = arith.constant 0 : index
    %c0_1 = arith.constant 0 : index
    %3 = vector.load %arg9[%c0, %c0_1] : memref<8x128xbf16, #tpu.memory_space<vmem>>, vector<8x128xbf16>
    %c0_2 = arith.constant 0 : index
    %c0_3 = arith.constant 0 : index
    %c0_4 = arith.constant 0 : index
    %4 = vector.load %arg2[%c0_2, %c0_3, %c0_4] : memref<1x8x128xf32, #tpu.memory_space<vmem>>, vector<1x8x128xf32>
    %5 = vector.shape_cast %4 : vector<1x8x128xf32> to vector<8x128xf32>
    %6 = arith.truncf %5 : vector<8x128xf32> to vector<8x128xbf16>
    %c0_5 = arith.constant 0 : index
    %c0_6 = arith.constant 0 : index
    %c0_7 = arith.constant 0 : index
    %7 = vector.load %arg3[%c0_5, %c0_6, %c0_7] : memref<1x8x128xf32, #tpu.memory_space<vmem>>, vector<1x8x128xf32>
    %8 = vector.shape_cast %7 : vector<1x8x128xf32> to vector<8x128xf32>
    %c0_8 = arith.constant 0 : index
    %c0_9 = arith.constant 0 : index
    %c0_10 = arith.constant 0 : index
    %9 = vector.load %arg4[%c0_8, %c0_9, %c0_10] : memref<1x128x512xbf16, #tpu.memory_space<vmem>>, vector<1x128x512xbf16>
    %10 = vector.shape_cast %9 : vector<1x128x512xbf16> to vector<128x512xbf16>
    %cst = arith.constant dense<0.000000e+00> : vector<8x512xf32>
    %11 = tpu.matmul %3, %10, %cst {dimension_numbers = #tpu.dot_dimension_numbers<[1], [0], [0], [1], [0, 0, 1, 1], [], []>} : vector<8x128xbf16>, vector<128x512xbf16>, vector<8x512xf32> -> vector<8x512xf32>
    %c0_11 = arith.constant 0 : index
    %c0_12 = arith.constant 0 : index
    %c0_13 = arith.constant 0 : index
    %12 = vector.load %arg5[%c0_11, %c0_12, %c0_13] : memref<1x128x512xbf16, #tpu.memory_space<vmem>>, vector<1x128x512xbf16>
    %13 = vector.shape_cast %12 : vector<1x128x512xbf16> to vector<128x512xbf16>
    %cst_14 = arith.constant dense<0.000000e+00> : vector<8x512xf32>
    %14 = tpu.matmul %6, %13, %cst_14 {dimension_numbers = #tpu.dot_dimension_numbers<[1], [0], [0], [1], [0, 0, 1, 1], [], []>} : vector<8x128xbf16>, vector<128x512xbf16>, vector<8x512xf32> -> vector<8x512xf32>
    %15 = arith.addf %11, %14 : vector<8x512xf32>
    %c0_15 = arith.constant 0 : index
    %c0_16 = arith.constant 0 : index
    %c0_17 = arith.constant 0 : index
    %16 = vector.load %arg6[%c0_15, %c0_16, %c0_17] : memref<1x1x512xf32, #tpu.memory_space<vmem>>, vector<1x1x512xf32>
    %17 = vector.shape_cast %16 : vector<1x1x512xf32> to vector<1x512xf32>
    %18 = vector.broadcast %17 : vector<1x512xf32> to vector<8x512xf32>
    %19 = arith.addf %15, %18 : vector<8x512xf32>
    %20 = vector.extract_strided_slice %19 {offsets = [0, 0], sizes = [8, 128], strides = [1, 1]} : vector<8x512xf32> to vector<8x128xf32>
    %21 = arith.negf %20 : vector<8x128xf32>
    %22 = math.exp %21 : vector<8x128xf32>
    %cst_18 = arith.constant 1.000000e+00 : f32
    %23 = vector.broadcast %cst_18 : f32 to vector<8x128xf32>
    %24 = arith.addf %23, %22 : vector<8x128xf32>
    %25 = arith.divf %23, %24 : vector<8x128xf32>
    %26 = vector.extract_strided_slice %19 {offsets = [0, 128], sizes = [8, 128], strides = [1, 1]} : vector<8x512xf32> to vector<8x128xf32>
    %27 = arith.negf %26 : vector<8x128xf32>
    %28 = math.exp %27 : vector<8x128xf32>
    %cst_19 = arith.constant 1.000000e+00 : f32
    %29 = vector.broadcast %cst_19 : f32 to vector<8x128xf32>
    %30 = arith.addf %29, %28 : vector<8x128xf32>
    %31 = arith.divf %29, %30 : vector<8x128xf32>
    %32 = vector.extract_strided_slice %19 {offsets = [0, 256], sizes = [8, 128], strides = [1, 1]} : vector<8x512xf32> to vector<8x128xf32>
    %33 = math.tanh %32 : vector<8x128xf32>
    %34 = vector.extract_strided_slice %19 {offsets = [0, 384], sizes = [8, 128], strides = [1, 1]} : vector<8x512xf32> to vector<8x128xf32>
    %35 = arith.negf %34 : vector<8x128xf32>
    %36 = math.exp %35 : vector<8x128xf32>
    %cst_20 = arith.constant 1.000000e+00 : f32
    %37 = vector.broadcast %cst_20 : f32 to vector<8x128xf32>
    %38 = arith.addf %37, %36 : vector<8x128xf32>
    %39 = arith.divf %37, %38 : vector<8x128xf32>
    %40 = arith.mulf %31, %8 : vector<8x128xf32>
    %41 = arith.mulf %25, %33 : vector<8x128xf32>
    %42 = arith.addf %40, %41 : vector<8x128xf32>
    %43 = math.tanh %42 : vector<8x128xf32>
    %44 = arith.mulf %39, %43 : vector<8x128xf32>
    %c0_21 = arith.constant 0 : index
    %c0_22 = arith.constant 0 : index
    %c0_23 = arith.constant 0 : index
    %45 = vector.load %arg7[%c0_21, %c0_22, %c0_23] : memref<1x8x128xf32, #tpu.memory_space<vmem>>, vector<1x8x128xf32>
    %46 = vector.shape_cast %45 : vector<1x8x128xf32> to vector<8x128xf32>
    %47 = vector.shape_cast %44 : vector<8x128xf32> to vector<1x8x128xf32>
    tpu.vector_store %arg7[%c0_21, %c0_22, %c0_23], %47 {strides = array<i32>} : memref<1x8x128xf32, #tpu.memory_space<vmem>>, vector<1x8x128xf32>,
    %c0_24 = arith.constant 0 : index
    %c0_25 = arith.constant 0 : index
    %c0_26 = arith.constant 0 : index
    %48 = vector.load %arg8[%c0_24, %c0_25, %c0_26] : memref<1x8x128xf32, #tpu.memory_space<vmem>>, vector<1x8x128xf32>
    %49 = vector.shape_cast %48 : vector<1x8x128xf32> to vector<8x128xf32>
    %50 = vector.shape_cast %42 : vector<8x128xf32> to vector<1x8x128xf32>
    tpu.vector_store %arg8[%c0_24, %c0_25, %c0_26], %50 {strides = array<i32>} : memref<1x8x128xf32, #tpu.memory_space<vmem>>, vector<1x8x128xf32>,
    %51 = arith.truncf %44 : vector<8x128xf32> to vector<8x128xbf16>
    %c0_27 = arith.constant 0 : index
    %c0_28 = arith.constant 0 : index
    %52 = vector.load %arg9[%c0_27, %c0_28] : memref<8x128xbf16, #tpu.memory_space<vmem>>, vector<8x128xbf16>
    tpu.vector_store %arg9[%c0_27, %c0_28], %51 {strides = array<i32>} : memref<8x128xbf16, #tpu.memory_space<vmem>>, vector<8x128xbf16>,
    return
  }
  func.func @transform_0(%arg0: i32) -> (i32, i32) {
    %c0_i32 = arith.constant 0 : i32
    %c0_i32_0 = arith.constant 0 : i32
    %c0_i32_1 = arith.constant 0 : i32
    return %c0_i32, %c0_i32_0 : i32, i32
  }
  func.func @transform_1(%arg0: i32) -> (i32, i32, i32) {
    %c0_i32 = arith.constant 0 : i32
    %c0_i32_0 = arith.constant 0 : i32
    %c0_i32_1 = arith.constant 0 : i32
    return %arg0, %c0_i32, %c0_i32_0 : i32, i32, i32
  }
  func.func @transform_2(%arg0: i32) -> (i32, i32, i32) {
    %c0_i32 = arith.constant 0 : i32
    %c0_i32_0 = arith.constant 0 : i32
    %c0_i32_1 = arith.constant 0 : i32
    return %arg0, %c0_i32, %c0_i32_0 : i32, i32, i32
  }
  func.func @transform_3(%arg0: i32) -> (i32, i32, i32) {
    %c0_i32 = arith.constant 0 : i32
    %c0_i32_0 = arith.constant 0 : i32
    %c0_i32_1 = arith.constant 0 : i32
    return %arg0, %c0_i32, %c0_i32_0 : i32, i32, i32
  }
  func.func @transform_4(%arg0: i32) -> (i32, i32, i32) {
    %c0_i32 = arith.constant 0 : i32
    %c0_i32_0 = arith.constant 0 : i32
    %c0_i32_1 = arith.constant 0 : i32
    return %arg0, %c0_i32, %c0_i32_0 : i32, i32, i32
  }
  func.func @transform_5(%arg0: i32) -> (i32, i32, i32) {
    %c0_i32 = arith.constant 0 : i32
    %c0_i32_0 = arith.constant 0 : i32
    %c0_i32_1 = arith.constant 0 : i32
    return %arg0, %c0_i32, %c0_i32_0 : i32, i32, i32
  }
  func.func @transform_6(%arg0: i32) -> (i32, i32, i32) {
    %c0_i32 = arith.constant 0 : i32
    %c0_i32_0 = arith.constant 0 : i32
    %c0_i32_1 = arith.constant 0 : i32
    return %arg0, %c0_i32, %c0_i32_0 : i32, i32, i32
  }
  func.func @transform_7(%arg0: i32) -> (i32, i32, i32) {
    %c0_i32 = arith.constant 0 : i32
    %c0_i32_0 = arith.constant 0 : i32
    %c0_i32_1 = arith.constant 0 : i32
    return %arg0, %c0_i32, %c0_i32_0 : i32, i32, i32
  }
}

module attributes {stable_mosaic.version = 11 : i64} {
  func.func @_fc_out_kernel(%arg0: i32, %arg1: memref<8x128xbf16, #tpu.memory_space<vmem>>, %arg2: memref<128x128xbf16, #tpu.memory_space<vmem>>, %arg3: memref<1x128xf32, #tpu.memory_space<vmem>>, %arg4: memref<8x128xf32, #tpu.memory_space<vmem>>) attributes {dimension_semantics = [#tpu.dimension_semantics<parallel>], iteration_bounds = array<i64: 1>, scalar_prefetch = 0 : i64, scratch_operands = 0 : i64, tpu.core_type = #tpu.core_type<tc>, window_params = [{pipeline_mode = #tpu.pipeline_mode<synchronous>, transform_indices = @transform_0, window_bounds = array<i64: 8, 128>}, {transform_indices = @transform_1, window_bounds = array<i64: 128, 128>}, {transform_indices = @transform_2, window_bounds = array<i64: 1, 128>}, {transform_indices = @transform_3, window_bounds = array<i64: 8, 128>}]} {
    %c0 = arith.constant 0 : index
    %c0_0 = arith.constant 0 : index
    %0 = vector.load %arg1[%c0, %c0_0] : memref<8x128xbf16, #tpu.memory_space<vmem>>, vector<8x128xbf16>
    %c0_1 = arith.constant 0 : index
    %c0_2 = arith.constant 0 : index
    %1 = vector.load %arg2[%c0_1, %c0_2] : memref<128x128xbf16, #tpu.memory_space<vmem>>, vector<128x128xbf16>
    %cst = arith.constant dense<0.000000e+00> : vector<8x128xf32>
    %2 = tpu.matmul %0, %1, %cst {dimension_numbers = #tpu.dot_dimension_numbers<[1], [0], [0], [1], [0, 0, 1, 1], [], []>} : vector<8x128xbf16>, vector<128x128xbf16>, vector<8x128xf32> -> vector<8x128xf32>
    %c0_3 = arith.constant 0 : index
    %c0_4 = arith.constant 0 : index
    %3 = vector.load %arg3[%c0_3, %c0_4] : memref<1x128xf32, #tpu.memory_space<vmem>>, vector<1x128xf32>
    %4 = vector.broadcast %3 : vector<1x128xf32> to vector<8x128xf32>
    %5 = arith.addf %2, %4 : vector<8x128xf32>
    %c0_5 = arith.constant 0 : index
    %c0_6 = arith.constant 0 : index
    %6 = vector.load %arg4[%c0_5, %c0_6] : memref<8x128xf32, #tpu.memory_space<vmem>>, vector<8x128xf32>
    tpu.vector_store %arg4[%c0_5, %c0_6], %5 {strides = array<i32>} : memref<8x128xf32, #tpu.memory_space<vmem>>, vector<8x128xf32>,
    return
  }
  func.func @transform_0(%arg0: i32) -> (i32, i32) {
    %c0_i32 = arith.constant 0 : i32
    %c0_i32_0 = arith.constant 0 : i32
    %c0_i32_1 = arith.constant 0 : i32
    return %c0_i32, %c0_i32_0 : i32, i32
  }
  func.func @transform_1(%arg0: i32) -> (i32, i32) {
    %c0_i32 = arith.constant 0 : i32
    %c0_i32_0 = arith.constant 0 : i32
    return %c0_i32, %arg0 : i32, i32
  }
  func.func @transform_2(%arg0: i32) -> (i32, i32) {
    %c0_i32 = arith.constant 0 : i32
    %c0_i32_0 = arith.constant 0 : i32
    return %c0_i32, %arg0 : i32, i32
  }
  func.func @transform_3(%arg0: i32) -> (i32, i32) {
    %c0_i32 = arith.constant 0 : i32
    %c0_i32_0 = arith.constant 0 : i32
    return %c0_i32, %arg0 : i32, i32
  }
}

</mosaic_0001>

<bundles_post_ra>
// kernel: _lambda_.3
= control target key start
LH: loop header
LB: loop body
LE: loop exit
PB: predicated region body
PF: predicated region fallthrough
CT: control target
= control target key end

     0   :  { %v180_v0 = vmov 0.0   ;;  %vm181_vm0 = vmmov 0   ;;  %s235_s1 = inlined_call_operand.vmem [shape: bf16[128,128], index: 1, kind: input, shape index: {}]   ;;  %s236_s0 = inlined_call_operand.vmem [shape: bf16[8,128], index: 0, kind: input, shape index: {}]   ;;  %s237_s2 = inlined_call_operand.vmem [shape: f32[1,128], index: 2, kind: input, shape index: {}]   ;;  %s238_s3 = inlined_call_operand.vmem [shape: f32[8,128], index: 3, kind: output, shape index: {}]  }
   0x1   :  { %150 = vmatprep.subr.bf16.mxu0 %v180_v0  ;;  %v172_v1 = vld [vmem:[%s235_s1] sm:$0xff]   ;;  %166 = vmatprep.mubr.msk.bf16.mxu0 %vm181_vm0, %v180_v0  ;;  %v173_v2 = vld [vmem:[%s235_s1 + $0x8] sm:$0xff]   ;;  %v174_v3 = vld [vmem:[%s235_s1 + $0x10] sm:$0xff]  }
   0x2   :  { %151 = vmatpush3.bf16.msra.mxu0 %v172_v1  ;;  %v175_v4 = vld [vmem:[%s235_s1 + $0x18] sm:$0xff]   ;;  %v176_v5 = vld [vmem:[%s235_s1 + $0x20] sm:$0xff]   ;;  %v177_v6 = vld [vmem:[%s235_s1 + $0x28] sm:$0xff]  }
   0x3   :  { %152 = vmatprep.subr.bf16.mxu0 %v180_v0  ;;  %v178_v7 = vld [vmem:[%s235_s1 + $0x30] sm:$0xff]   ;;  %v179_v8 = vld [vmem:[%s235_s1 + $0x38] sm:$0xff]   ;;  %v15_v9 = vld [vmem:[%s236_s0] sm:$0xf] }
   0x4   :  { %v132_v10 = vld [vmem:[%s237_s2] ss:$0 sm:$0xff] }
   0x6   :  { %153 = vmatpush3.bf16.msra.mxu0 %v173_v2 }
   0x7   :  { %154 = vmatprep.subr.bf16.mxu0 %v180_v0 }
   0xa   :  { %155 = vmatpush3.bf16.msra.mxu0 %v174_v3 }
   0xb   :  { %156 = vmatprep.subr.bf16.mxu0 %v180_v0 }
   0xe   :  { %157 = vmatpush3.bf16.msra.mxu0 %v175_v4 }
   0xf   :  { %158 = vmatprep.subr.bf16.mxu0 %v180_v0 }
  0x12   :  { %159 = vmatpush3.bf16.msra.mxu0 %v176_v5 }
  0x13   :  { %160 = vmatprep.subr.bf16.mxu0 %v180_v0 }
  0x16   :  { %161 = vmatpush3.bf16.msra.mxu0 %v177_v6 }
  0x17   :  { %162 = vmatprep.subr.bf16.mxu0 %v180_v0 }
  0x1a   :  { %163 = vmatpush3.bf16.msra.mxu0 %v178_v7 }
  0x1b   :  { %164 = vmatprep.subr.bf16.mxu0 %v180_v0 }
  0x1e   :  { %165 = vmatpush3.bf16.msra.mxu0 %v179_v8 }
  0x21   :  { %167 = vmatmul.mubr.bf16.vlgmr.msra.gmra.mrb[0].mxu0 %v15_v9 }
  0xf4   :  { %v121_v11 = vpop.f32.mrb[0].mxu0 }
  0xf5   :  { %v122_v12 = vadd.f32 %v132_v10, %v121_v11  ;;  %v168_v13 = vpop.f32.mrb[1].mxu0 }
  0xf6   :  { %v124_v14 = vpop.f32.mrb[2].mxu0 }
  0xf7   :  { %127 = vst [vmem:[%s238_s3] sm:$0xff] %v122_v12  ;;  %v169_v15 = vpop.f32.mrb[3].mxu0 }

// kernel: _lambda_.2
= control target key start
LH: loop header
LB: loop body
LE: loop exit
PB: predicated region body
PF: predicated region fallthrough
CT: control target
= control target key end

     0   :  { %s1360_s24 = smov 0   ;;  %s1496_s0 = inlined_call_operand.vmem [shape: bf16[8,128], index: 0, kind: input, shape index: {}]   ;;  %s1497_s1 = inlined_call_operand.vmem [shape: f32[2,8,128], index: 1, kind: input, shape index: {}]   ;;  %s1498_s2 = inlined_call_operand.vmem [shape: f32[2,8,128], index: 2, kind: input, shape index: {}]   ;;  %s1499_s3 = inlined_call_operand.vmem [shape: bf16[2,128,512], index: 3, kind: input, shape index: {}]   ;;  %s1500_s4 = inlined_call_operand.vmem [shape: bf16[2,128,512], index: 4, kind: input, shape index: {}]   ;;  %s1501_s5 = inlined_call_operand.vmem [shape: f32[2,1,512], index: 5, kind: input, shape index: {}]   ;;  %s1502_s6 = inlined_call_operand.vmem [shape: f32[2,8,128], index: 6, kind: output, shape index: {0}]   ;;  %s1503_s7 = inlined_call_operand.vmem [shape: f32[2,8,128], index: 7, kind: output, shape index: {1}]  }
   0x1 LB: > { %s1104_s25 = sadd.s32 4294967295, %s1317_s24   ;;  %p1108_p0 = scmp.ge.s32.totalorder %s1317_s24, 1  ;;  %s1317_s24 = sphi %s1360_s24, %s18_s24  }
   0x2   : > { %p277_p1 = scmp.lt.s32.totalorder %s1317_s24, 3 }
   0x4   : > { %p278_p2 = pnand %p1108_p0, %p277_p1 }
   0x5   : > { %p329_p3 = scmp.lt.s32.totalorder (!%p278_p2), %s1104_s25, 1  ;;  %p1118_p4 = scmp.ne.s32.totalorder (!%p278_p2), %s1104_s25, 0 }
   0x6   : > { %281 = sbr.rel (%p278_p2) target bundleno = 350 (0x15e), region = 44 }
   0xd   : > { %s330_s26 = scalar_select %p329_p3, %s1104_s25, 1 }
   0xe   : > { %363 = sbr.rel (%p1118_p4) target bundleno = 21 (0x15), region = 48  ;;  %v364_v0 = vld [vmem:[%s1496_s0] sm:$0xf] (!%p1118_p4) }
   0xf   : > { %s1368_s27 = sshll.u32 %s330_s26, 3  ;;  %s1188_s28 = sshll.u32 %s330_s26, 8  ;;  %365 = vst [vmem:[#allocation2] sm:$0xf] (!%p1118_p4), %v364_v0 }
  0x10   : > { %s332_s8 = scalar_lea.vmem %s1497_s1, %s1368_s27  ;;  %s336_s11 = scalar_lea.vmem %s1498_s2, %s1368_s27 }
  0x11   : > { %s1381_s14 = scalar_lea.vmem %s1499_s3, %s1188_s28  ;;  %s1386_s17 = scalar_lea.vmem %s1500_s4, %s1188_s28 }
  0x12   : > { %s1115_s18 = sshll.u32 %s330_s26, 2  ;;  %s354_s21 = scalar_lea.vmem %s1502_s6, %s1368_s27 }
  0x13   : > { %s1395_s29 = scalar_lea.vmem %s1501_s5, %s1115_s18  ;;  %s358_s10 = scalar_lea.vmem %s1503_s7, %s1368_s27 }
  0x15 PF: > { %v1199_v1 = vld [vmem:[%s1386_s17 + $0x4] ss:$16 sps:$4 sm:$0xff]   ;;  %v1201_v2 = vld [vmem:[%s1386_s17 + $0xc] ss:$16 sps:$4 sm:$0xff]   ;;  %v1319_v3 = vmov 0  }
  0x16   : > { %626 = vmatprep.mubr.bf16.mxu0 %v1319_v3  ;;  %667 = vmatprep.mubr.bf16.mxu1 %v1319_v3  ;;  %v1203_v4 = vld [vmem:[%s1386_s17] ss:$16 sps:$4 sm:$0xff]   ;;  %v1204_v5 = vld [vmem:[%s1386_s17 + $0x8] ss:$16 sps:$4 sm:$0xff]   ;;  %v1205_v6 = vld [vmem:[%s1386_s17 + $0x24] ss:$16 sps:$4 sm:$0xff]  }
  0x17   : > { %594 = vmatprep.subr.bf16.mxu0 %v1199_v1  ;;  %635 = vmatprep.subr.bf16.mxu1 %v1201_v2  ;;  %v1207_v7 = vld [vmem:[%s1386_s17 + $0x2c] ss:$16 sps:$4 sm:$0xff]   ;;  %v1209_v8 = vld [vmem:[%s1386_s17 + $0x20] ss:$16 sps:$4 sm:$0xff]   ;;  %v1210_v9 = vld [vmem:[%s1386_s17 + $0x28] ss:$16 sps:$4 sm:$0xff]  }
  0x18   : > { %595 = vmatpush1.bf16.msra.mxu0 %v1203_v4  ;;  %636 = vmatpush1.bf16.msra.mxu1 %v1204_v5  ;;  %v1211_v10 = vld [vmem:[%s1386_s17 + $0x44] ss:$16 sps:$4 sm:$0xff]   ;;  %v1213_v11 = vld [vmem:[%s1386_s17 + $0x4c] ss:$16 sps:$4 sm:$0xff]   ;;  %v1215_v12 = vld [vmem:[%s1386_s17 + $0x40] ss:$16 sps:$4 sm:$0xff]  }
  0x19   : > { %596 = vmatprep.subr.bf16.mxu0 %v1205_v6  ;;  %637 = vmatprep.subr.bf16.mxu1 %v1207_v7  ;;  %v1216_v13 = vld [vmem:[%s1386_s17 + $0x48] ss:$16 sps:$4 sm:$0xff]   ;;  %v1217_v14 = vld [vmem:[%s1386_s17 + $0x64] ss:$16 sps:$4 sm:$0xff]   ;;  %v1219_v15 = vld [vmem:[%s1386_s17 + $0x6c] ss:$16 sps:$4 sm:$0xff]  }
  0x1a   : > { %v1221_v16 = vld [vmem:[%s1386_s17 + $0x60] ss:$16 sps:$4 sm:$0xff]   ;;  %v1222_v17 = vld [vmem:[%s1386_s17 + $0x68] ss:$16 sps:$4 sm:$0xff]   ;;  %v1223_v18 = vld [vmem:[%s1386_s17 + $0x84] ss:$16 sps:$4 sm:$0xff]  }
  0x1b   : > { %v1225_v19 = vld [vmem:[%s1386_s17 + $0x8c] ss:$16 sps:$4 sm:$0xff]   ;;  %v1227_v20 = vld [vmem:[%s1386_s17 + $0x80] ss:$16 sps:$4 sm:$0xff]   ;;  %v1228_v21 = vld [vmem:[%s1386_s17 + $0x88] ss:$16 sps:$4 sm:$0xff]  }
  0x1c   : > { %597 = vmatpush1.bf16.msra.mxu0 %v1209_v8  ;;  %638 = vmatpush1.bf16.msra.mxu1 %v1210_v9  ;;  %v1229_v22 = vld [vmem:[%s1386_s17 + $0xa4] ss:$16 sps:$4 sm:$0xff]   ;;  %v1231_v23 = vld [vmem:[%s1386_s17 + $0xac] ss:$16 sps:$4 sm:$0xff]   ;;  %v1233_v24 = vld [vmem:[%s1386_s17 + $0xa0] ss:$16 sps:$4 sm:$0xff]  }
  0x1d   : > { %598 = vmatprep.subr.bf16.mxu0 %v1211_v10  ;;  %639 = vmatprep.subr.bf16.mxu1 %v1213_v11  ;;  %v1234_v25 = vld [vmem:[%s1386_s17 + $0xa8] ss:$16 sps:$4 sm:$0xff]   ;;  %v1235_v26 = vld [vmem:[%s1386_s17 + $0xc4] ss:$16 sps:$4 sm:$0xff]   ;;  %v1237_v27 = vld [vmem:[%s1386_s17 + $0xcc] ss:$16 sps:$4 sm:$0xff]  }
  0x1e   : > { %v1239_v28 = vld [vmem:[%s1386_s17 + $0xc0] ss:$16 sps:$4 sm:$0xff]   ;;  %v1240_v29 = vld [vmem:[%s1386_s17 + $0xc8] ss:$16 sps:$4 sm:$0xff]   ;;  %v1241_v30 = vld [vmem:[%s1386_s17 + $0xe4] ss:$16 sps:$4 sm:$0xff]  }
  0x1f   : > { %v1243_v31 = vld [vmem:[%s1386_s17 + $0xec] ss:$16 sps:$4 sm:$0xff]   ;;  %v1245_v32 = vld [vmem:[%s1386_s17 + $0xe0] ss:$16 sps:$4 sm:$0xff]   ;;  %v1246_v33 = vld [vmem:[%s1386_s17 + $0xe8] ss:$16 sps:$4 sm:$0xff]  }
  0x20   : > { %599 = vmatpush1.bf16.msra.mxu0 %v1215_v12  ;;  %640 = vmatpush1.bf16.msra.mxu1 %v1216_v13  ;;  %v367_v34 = vld [vmem:[%s332_s8] sm:$0xff]  ;;  %v1252_v36 = vld [vmem:[%s1381_s14 + $0xc] ss:$16 sps:$4 sm:$0xff]   ;;  %v1250_v39 = vld [vmem:[%s1381_s14 + $0x8] ss:$16 sps:$4 sm:$0xff]   ;;  %v920_v13 = vlaneseq }
  0x21   : > { %600 = vmatprep.subr.bf16.mxu0 %v1217_v14  ;;  %641 = vmatprep.subr.bf16.mxu1 %v1219_v15  ;;  %v1249_v35 = vld [vmem:[%s1381_s14 + $0x4] ss:$16 sps:$4 sm:$0xff]   ;;  %v368_v37 = vpack.c.bf16 %v367_v34, %v367_v34  ;;  %v1247_v38 = vld [vmem:[%s1381_s14] ss:$16 sps:$4 sm:$0xff]   ;;  %v1258_v41 = vld [vmem:[%s1381_s14 + $0x2c] ss:$16 sps:$4 sm:$0xff]  }
  0x22   : > { %v1255_v40 = vld [vmem:[%s1381_s14 + $0x24] ss:$16 sps:$4 sm:$0xff]   ;;  %v1253_v42 = vld [vmem:[%s1381_s14 + $0x20] ss:$16 sps:$4 sm:$0xff]   ;;  %v1256_v43 = vld [vmem:[%s1381_s14 + $0x28] ss:$16 sps:$4 sm:$0xff]  }
  0x23   : > { %v1261_v44 = vld [vmem:[%s1381_s14 + $0x44] ss:$16 sps:$4 sm:$0xff]   ;;  %v1264_v45 = vld [vmem:[%s1381_s14 + $0x4c] ss:$16 sps:$4 sm:$0xff]   ;;  %v1259_v46 = vld [vmem:[%s1381_s14 + $0x40] ss:$16 sps:$4 sm:$0xff]  }
  0x24   : > { %601 = vmatpush1.bf16.msra.mxu0 %v1221_v16  ;;  %642 = vmatpush1.bf16.msra.mxu1 %v1222_v17  ;;  %v1262_v47 = vld [vmem:[%s1381_s14 + $0x48] ss:$16 sps:$4 sm:$0xff]   ;;  %v1267_v48 = vld [vmem:[%s1381_s14 + $0x64] ss:$16 sps:$4 sm:$0xff]   ;;  %v1270_v49 = vld [vmem:[%s1381_s14 + $0x6c] ss:$16 sps:$4 sm:$0xff]  }
  0x25   : > { %602 = vmatprep.subr.bf16.mxu0 %v1223_v18  ;;  %643 = vmatprep.subr.bf16.mxu1 %v1225_v19  ;;  %v1265_v50 = vld [vmem:[%s1381_s14 + $0x60] ss:$16 sps:$4 sm:$0xff]   ;;  %v1268_v51 = vld [vmem:[%s1381_s14 + $0x68] ss:$16 sps:$4 sm:$0xff]   ;;  %v1273_v52 = vld [vmem:[%s1381_s14 + $0x84] ss:$16 sps:$4 sm:$0xff]  }
  0x26   : > { %v1276_v53 = vld [vmem:[%s1381_s14 + $0x8c] ss:$16 sps:$4 sm:$0xff]   ;;  %v1271_v54 = vld [vmem:[%s1381_s14 + $0x80] ss:$16 sps:$4 sm:$0xff]   ;;  %v1274_v55 = vld [vmem:[%s1381_s14 + $0x88] ss:$16 sps:$4 sm:$0xff]  }
  0x27   : > { %v1279_v56 = vld [vmem:[%s1381_s14 + $0xa4] ss:$16 sps:$4 sm:$0xff]   ;;  %v1282_v57 = vld [vmem:[%s1381_s14 + $0xac] ss:$16 sps:$4 sm:$0xff]   ;;  %v1277_v58 = vld [vmem:[%s1381_s14 + $0xa0] ss:$16 sps:$4 sm:$0xff]  }
  0x28   : > { %603 = vmatpush1.bf16.msra.mxu0 %v1227_v20  ;;  %644 = vmatpush1.bf16.msra.mxu1 %v1228_v21  ;;  %v1280_v59 = vld [vmem:[%s1381_s14 + $0xa8] ss:$16 sps:$4 sm:$0xff]   ;;  %v1285_v60 = vld [vmem:[%s1381_s14 + $0xc4] ss:$16 sps:$4 sm:$0xff]   ;;  %v1288_v61 = vld [vmem:[%s1381_s14 + $0xcc] ss:$16 sps:$4 sm:$0xff]  }
  0x29   : > { %604 = vmatprep.subr.bf16.mxu0 %v1229_v22  ;;  %645 = vmatprep.subr.bf16.mxu1 %v1231_v23  ;;  %v1283_v62 = vld [vmem:[%s1381_s14 + $0xc0] ss:$16 sps:$4 sm:$0xff]   ;;  %v1286_v63 = vld [vmem:[%s1381_s14 + $0xc8] ss:$16 sps:$4 sm:$0xff]   ;;  %v1291_v0 = vld [vmem:[%s1381_s14 + $0xe4] ss:$16 sps:$4 sm:$0xff]  }
  0x2a   : > { %v1294_v1 = vld [vmem:[%s1381_s14 + $0xec] ss:$16 sps:$4 sm:$0xff]   ;;  %v1289_v2 = vld [vmem:[%s1381_s14 + $0xe0] ss:$16 sps:$4 sm:$0xff]   ;;  %v921_v14 = vshrl.u32 %v920_v13, 7 }
  0x2b   : > { %v366_v4 = vld [vmem:[#allocation2] sm:$0xf] }
  0x2c   : > { %605 = vmatpush1.bf16.msra.mxu0 %v1233_v24  ;;  %646 = vmatpush1.bf16.msra.mxu1 %v1234_v25  ;;  %v922_v15 = vsub.s32 0, %v921_v14  ;;  %v918_v16 = vld [vmem:[%s1395_s29] sm:$0xf]  ;;  %v926_v17 = vsub.s32 1, %v921_v14 }
  0x2d   : > { %606 = vmatprep.subr.bf16.mxu0 %v1235_v26  ;;  %647 = vmatprep.subr.bf16.mxu1 %v1237_v27 }
  0x2e   : > { %v923_v18 = vrot.slane %v918_v16, %v922_v15  ;;  %v927_v21 = vrot.slane %v918_v16, %v926_v17 }
  0x30   : > { %607 = vmatpush1.bf16.msra.mxu0 %v1239_v28  ;;  %648 = vmatpush1.bf16.msra.mxu1 %v1240_v29  ;;  %v934_v28 = vsub.s32 3, %v921_v14 }
  0x31   : > { %608 = vmatprep.subr.bf16.mxu0 %v1241_v30  ;;  %649 = vmatprep.subr.bf16.mxu1 %v1243_v31 }
  0x34   : > { %609 = vmatpush1.bf16.msra.mxu0 %v1245_v32  ;;  %650 = vmatpush1.bf16.msra.mxu1 %v1246_v33 }
  0x35   : > { %836 = vmatprep.subr.bf16.mxu0 %v1249_v35  ;;  %877 = vmatprep.subr.bf16.mxu1 %v1252_v36 }
  0x37   : > { %627 = vmatmul.mubr.bf16.vlgmr.msra.gmra.mrb[0].mxu0 %v368_v37  ;;  %668 = vmatmul.mubr.bf16.vlgmr.msra.gmra.mrb[0].mxu1 %v368_v37  ;;  %v935_v37 = vrot.slane %v918_v16, %v934_v28 }
  0x38   : > { %837 = vmatpush1.bf16.msra.mxu0 %v1247_v38  ;;  %878 = vmatpush1.bf16.msra.mxu1 %v1250_v39  ;;  %v930_v38 = vsub.s32 2, %v921_v14 }
  0x39   : > { %838 = vmatprep.subr.bf16.mxu0 %v1255_v40  ;;  %879 = vmatprep.subr.bf16.mxu1 %v1258_v41 }
  0x3a   : > { %868 = vmatprep.mubr.bf16.mxu0 %v1319_v3  ;;  %909 = vmatprep.mubr.bf16.mxu1 %v1319_v3  ;;  %v1292_v3 = vld [vmem:[%s1381_s14 + $0xe8] ss:$16 sps:$4 sm:$0xff]   ;;  %v931_v40 = vrot.slane %v918_v16, %v930_v38 }
  0x3c   : > { %839 = vmatpush1.bf16.msra.mxu0 %v1253_v42  ;;  %880 = vmatpush1.bf16.msra.mxu1 %v1256_v43 }
  0x3d   : > { %840 = vmatprep.subr.bf16.mxu0 %v1261_v44  ;;  %881 = vmatprep.subr.bf16.mxu1 %v1264_v45 }
  0x40   : > { %841 = vmatpush1.bf16.msra.mxu0 %v1259_v46  ;;  %882 = vmatpush1.bf16.msra.mxu1 %v1262_v47 }
  0x41   : > { %842 = vmatprep.subr.bf16.mxu0 %v1267_v48  ;;  %883 = vmatprep.subr.bf16.mxu1 %v1270_v49  ;;  %v369_v49 = vld [vmem:[%s336_s11] sm:$0xff] }
  0x44   : > { %843 = vmatpush1.bf16.msra.mxu0 %v1265_v50  ;;  %884 = vmatpush1.bf16.msra.mxu1 %v1268_v51 }
  0x45   : > { %844 = vmatprep.subr.bf16.mxu0 %v1273_v52  ;;  %885 = vmatprep.subr.bf16.mxu1 %v1276_v53 }
  0x48   : > { %845 = vmatpush1.bf16.msra.mxu0 %v1271_v54  ;;  %886 = vmatpush1.bf16.msra.mxu1 %v1274_v55 }
  0x49   : > { %846 = vmatprep.subr.bf16.mxu0 %v1279_v56  ;;  %887 = vmatprep.subr.bf16.mxu1 %v1282_v57 }
  0x4c   : > { %847 = vmatpush1.bf16.msra.mxu0 %v1277_v58  ;;  %888 = vmatpush1.bf16.msra.mxu1 %v1280_v59 }
  0x4d   : > { %848 = vmatprep.subr.bf16.mxu0 %v1285_v60  ;;  %889 = vmatprep.subr.bf16.mxu1 %v1288_v61 }
  0x50   : > { %849 = vmatpush1.bf16.msra.mxu0 %v1283_v62  ;;  %890 = vmatpush1.bf16.msra.mxu1 %v1286_v63 }
  0x51   : > { %850 = vmatprep.subr.bf16.mxu0 %v1291_v0  ;;  %891 = vmatprep.subr.bf16.mxu1 %v1294_v1 }
  0x54   : > { %851 = vmatpush1.bf16.msra.mxu0 %v1289_v2  ;;  %892 = vmatpush1.bf16.msra.mxu1 %v1292_v3 }
  0x57   : > { %869 = vmatmul.mubr.bf16.vlgmr.msra.gmra.mrb[4].mxu0 %v366_v4  ;;  %910 = vmatmul.mubr.bf16.vlgmr.msra.gmra.mrb[4].mxu1 %v366_v4 }
 0x10a   : > { %v628_v5 = vpop.f32.mrb[0].mxu0  ;;  %v669_v6 = vpop.f32.mrb[0].mxu1 }
 0x10b   : > { %v630_v7 = vpop.f32.mrb[1].mxu0  ;;  %v671_v8 = vpop.f32.mrb[1].mxu1 }
 0x10c   : > { %v632_v9 = vpop.f32.mrb[2].mxu0  ;;  %v673_v10 = vpop.f32.mrb[2].mxu1 }
 0x10d   : > { %v633_v11 = vpop.f32.mrb[3].mxu0  ;;  %v674_v12 = vpop.f32.mrb[3].mxu1 }
 0x12a   : > { %v870_v19 = vpop.f32.mrb[4].mxu0  ;;  %v911_v20 = vpop.f32.mrb[4].mxu1 }
 0x12b   : > { %v871_v22 = vadd.f32 %v870_v19, %v628_v5  ;;  %v912_v23 = vadd.f32 %v911_v20, %v669_v6  ;;  %v872_v24 = vpop.f32.mrb[5].mxu0  ;;  %v913_v25 = vpop.f32.mrb[5].mxu1 }
 0x12c   : > { %v873_v26 = vadd.f32 %v872_v24, %v630_v7  ;;  %v914_v27 = vadd.f32 %v913_v25, %v671_v8  ;;  %v874_v29 = vpop.f32.mrb[6].mxu0  ;;  %v915_v30 = vpop.f32.mrb[6].mxu1 }
 0x12d   : > { %v940_v31 = vadd.f32 %v923_v18, %v871_v22  ;;  %v875_v32 = vpop.f32.mrb[7].mxu0  ;;  %v916_v33 = vpop.f32.mrb[7].mxu1  ;;  %v942_v42 = vadd.f32 %v931_v40, %v912_v23 }
 0x12e   : > { %v941_v34 = vadd.f32 %v927_v21, %v873_v26  ;;  %v943_v39 = vadd.f32 %v935_v37, %v914_v27 }
 0x12f   : > { %v1183_v35 = vmul.f32 -1.442695, %v940_v31 }
 0x130   : > { %v1184_v36 = vmul.f32 -1.442695, %v941_v34  ;;  %v1185_v41 = vmul.f32 -1.442695, %v943_v39 }
 0x131   : > { %1295 = vpow2.f32 %v1183_v35 }
 0x132   : > { %1297 = vpow2.f32 %v1184_v36 }
 0x133   : > { %1299 = vpow2.f32 %v1185_v41 }
 0x134   : > { %1301 = vtanh.f32 %v942_v42 }
 0x13b   : > { %v1296_v43 = vpop.eup %1295 }
 0x13c   : > { %v1298_v44 = vpop.eup %1297  ;;  %v947_v45 = vadd.f32 1.0, %v1296_v43 }
 0x13d   : > { %v953_v46 = vadd.f32 1.0, %v1298_v44  ;;  %v1300_v47 = vpop.eup %1299 }
 0x13e   : > { %1303 = vrcp.f32 %v947_v45  ;;  %v1302_v48 = vpop.eup %1301  ;;  %v960_v53 = vadd.f32 1.0, %v1300_v47 }
 0x13f   : > { %1305 = vrcp.f32 %v953_v46 }
 0x140   : > { %1307 = vrcp.f32 %v960_v53 }
 0x148   : > { %v1304_v50 = vpop.eup %1303 }
 0x149   : > { %v1306_v51 = vpop.eup %1305  ;;  %v964_v52 = vmul.f32 %v1304_v50, %v1302_v48 }
 0x14a   : > { %v963_v54 = vmul.f32 %v1306_v51, %v369_v49  ;;  %v1308_v56 = vpop.eup %1307 }
 0x14c   : > { %v965_v55 = vadd.f32 %v964_v52, %v963_v54 }
 0x14e   : > { %1309 = vtanh.f32 %v965_v55  ;;  %969 = vst [vmem:[%s358_s10] sm:$0xff] %v965_v55 }
 0x158   : > { %v1310_v57 = vpop.eup %1309 }
 0x159   : > { %v967_v58 = vmul.f32 %v1310_v57, %v1308_v56 }
 0x15b   : > { %968 = vst [vmem:[%s354_s21] sm:$0xff] %v967_v58  ;;  %v970_v59 = vpack.c.bf16 %v967_v58, %v967_v58 }
 0x15d   : > { %971 = vst [vmem:[#allocation2] sm:$0xf] %v970_v59 }
 0x15e PF: > { %s18_s24 = sadd.s32 1, %s1317_s24  }
 0x15f   : > { %p15_p5 = scmp.ge.s32.totalorder %s18_s24, 4  }
 0x161   :  { %17 = sbr.rel (!%p15_p5) target bundleno = 1 (0x1), region = 102 }

</bundles_post_ra>
